<compile_context>
chip_gen: v6e
topology: v6e:2x2x1
jax: 0.10.0
libtpu: 0.0.40
codegen_flags: <defaults>
</compile_context>

<pallas_src>
import functools

import jax
import jax.numpy as jnp
from jax.experimental import pallas as pl
from jax.experimental.pallas import tpu as pltpu

LANE = 128      # final-layer output features padded to one full lane width
SUBLANE = 8     # batch rows padded to one full sublane group
OUT_FEATURES = 10
HIDDEN = 32


def _fused_mlp_kernel(x_ref, w1_ref, b1_ref, w2_ref, b2_ref, w3_ref, b3_ref,
                      o_ref):
    """Fused MLP: relu(relu(x@W1+b1)@W2+b2)@W3+b3.

    Matmul operands are bf16 (MXU-native on v5e/v6e/v7x) with f32 accumulation;
    bias adds and ReLUs stay in f32 values on the VPU.
    """
    x = x_ref[...].astype(jnp.bfloat16)
    h = jnp.dot(x, w1_ref[...], preferred_element_type=jnp.float32)
    h = jnp.maximum(h + b1_ref[...], 0.0)

    h = jnp.dot(h.astype(jnp.bfloat16), w2_ref[...],
                preferred_element_type=jnp.float32)
    h = jnp.maximum(h + b2_ref[...], 0.0)

    y = jnp.dot(h.astype(jnp.bfloat16), w3_ref[...],
                preferred_element_type=jnp.float32)
    y = y + b3_ref[...]

    # Single (8, 128) lane- and sublane-dense store.
    o_ref[...] = y.astype(o_ref.dtype)


def fused_mlp(x, w1, b1, w2, b2, w3p, b3p):
    """x: (Bp, Fin) f32, Bp multiple of 8.  Returns (Bp, LANE) f32 (padded)."""
    Bp, Fin = x.shape
    out_pad = w3p.shape[1]

    flops = 2 * Bp * (Fin * w1.shape[1]
                      + w2.shape[0] * w2.shape[1]
                      + w3p.shape[0] * w3p.shape[1])
    bytes_accessed = (4 * x.size                                   # f32 input
                      + 2 * (w1.size + w2.size + w3p.size)         # bf16 weights
                      + 4 * (b1.size + b2.size + b3p.size)         # f32 biases
                      + 4 * Bp * out_pad)                          # f32 output

    vmem_spec = pl.BlockSpec(memory_space=pltpu.MemorySpace.VMEM)

    return pl.pallas_call(
        _fused_mlp_kernel,
        out_shape=jax.ShapeDtypeStruct((Bp, out_pad), jnp.float32),
        in_specs=[vmem_spec] * 7,
        out_specs=vmem_spec,
        cost_estimate=pl.CostEstimate(
            flops=flops, transcendentals=0, bytes_accessed=bytes_accessed),
    )(x, w1, b1, w2, b2, w3p, b3p)


def init_params(key, sizes):
    """Deterministic f32 init. sizes = [Fin, h1, ..., Fout]; W as (F_in, F_out)."""
    params = []
    for fin, fout in zip(sizes[:-1], sizes[1:]):
        kw, kb, key = jax.random.split(key, 3)
        bound = 1.0 / jnp.sqrt(jnp.float32(fin))
        w = jax.random.uniform(kw, (fin, fout), jnp.float32, -bound, bound)
        b = jax.random.uniform(kb, (1, fout), jnp.float32, -bound, bound)
        params.append((w, b))
    return params


def prepare_params(params, lane=LANE):
    """One-time prep: bf16 weights, final layer zero-padded to `lane` lanes."""
    (w1, b1), (w2, b2), (w3, b3) = params
    fout = w3.shape[1]
    pad = lane - fout
    w3p = jnp.pad(w3, ((0, 0), (0, pad))).astype(jnp.bfloat16)
    b3p = jnp.pad(b3, ((0, 0), (0, pad)))
    prepped = [(w1.astype(jnp.bfloat16), b1),
               (w2.astype(jnp.bfloat16), b2),
               (w3p, b3p)]
    return jax.tree_util.tree_map(jax.device_put, prepped), fout


@functools.partial(jax.jit, static_argnums=(2,))
def p1_net_forward(x_nchw, padded_params, fout):
    """Forward pass of P1_Net (Flatten + 3-layer MLP), fully fused under jit."""
    (w1, b1), (w2, b2), (w3p, b3p) = padded_params
    B = x_nchw.shape[0]
    x = x_nchw.reshape(B, -1)                       # nn.Flatten()
    pad_rows = (-B) % SUBLANE                       # batch -> multiple of 8
    x_p = jnp.pad(x, ((0, pad_rows), (0, 0)))
    y_pad = fused_mlp(x_p, w1, b1, w2, b2, w3p, b3p)
    return y_pad[:B, :fout]


if __name__ == "__main__":
    key = jax.random.PRNGKey(0)
    kx, kp = jax.random.split(key)

    # Input consistent with an NCHW image batch: (B=2, C=4, H=16, W=16)
    x = jax.random.normal(kx, (2, 4, 16, 16), jnp.float32)

    Fin = 4 * 16 * 16  # 1024 after Flatten
    params = init_params(kp, [Fin, HIDDEN, HIDDEN, OUT_FEATURES])

    # One-time parameter prep (padding + bf16 cast) — outside the call path.
    padded_params, fout = prepare_params(params)

    out = p1_net_forward(x, padded_params, fout)
    out = jax.block_until_ready(out)

    # Pure-JAX reference using the same prepared (bf16) parameters.
    ref = x.reshape(2, -1)
    for i, (w, b) in enumerate(padded_params):
        ref = jnp.dot(ref.astype(jnp.bfloat16), w,
                      preferred_element_type=jnp.float32) + b
        if i < len(padded_params) - 1:
            ref = jnp.maximum(ref, 0.0)
    ref = ref[:, :fout]

    assert out.shape == (2, OUT_FEATURES)
    assert jnp.allclose(out, ref, atol=1e-4, rtol=1e-4)

    print("KERNEL_OK")
</pallas_src>

<mosaic_0001>
module attributes {stable_mosaic.version = 11 : i64} {
  func.func @_fused_mlp_kernel(%arg0: memref<8x1024xf32, #tpu.memory_space<vmem>>, %arg1: memref<1024x32xbf16, #tpu.memory_space<vmem>>, %arg2: memref<1x32xf32, #tpu.memory_space<vmem>>, %arg3: memref<32x32xbf16, #tpu.memory_space<vmem>>, %arg4: memref<1x32xf32, #tpu.memory_space<vmem>>, %arg5: memref<32x128xbf16, #tpu.memory_space<vmem>>, %arg6: memref<1x128xf32, #tpu.memory_space<vmem>>, %arg7: memref<8x128xf32, #tpu.memory_space<vmem>>) attributes {dimension_semantics = [], scalar_prefetch = 0 : i64, scratch_operands = 0 : i64, tpu.core_type = #tpu.core_type<tc>} {
    %c0 = arith.constant 0 : index
    %c0_0 = arith.constant 0 : index
    %0 = vector.load %arg0[%c0, %c0_0] : memref<8x1024xf32, #tpu.memory_space<vmem>>, vector<8x1024xf32>
    %1 = arith.truncf %0 : vector<8x1024xf32> to vector<8x1024xbf16>
    %c0_1 = arith.constant 0 : index
    %c0_2 = arith.constant 0 : index
    %2 = vector.load %arg1[%c0_1, %c0_2] : memref<1024x32xbf16, #tpu.memory_space<vmem>>, vector<1024x32xbf16>
    %cst = arith.constant dense<0.000000e+00> : vector<8x32xf32>
    %3 = tpu.matmul %1, %2, %cst {dimension_numbers = #tpu.dot_dimension_numbers<[1], [0], [0], [1], [0, 0, 1, 1], [], []>} : vector<8x1024xbf16>, vector<1024x32xbf16>, vector<8x32xf32> -> vector<8x32xf32>
    %c0_3 = arith.constant 0 : index
    %c0_4 = arith.constant 0 : index
    %4 = vector.load %arg2[%c0_3, %c0_4] : memref<1x32xf32, #tpu.memory_space<vmem>>, vector<1x32xf32>
    %5 = vector.broadcast %4 : vector<1x32xf32> to vector<8x32xf32>
    %6 = arith.addf %3, %5 : vector<8x32xf32>
    %cst_5 = arith.constant 0.000000e+00 : f32
    %7 = vector.broadcast %cst_5 : f32 to vector<8x32xf32>
    %8 = arith.maximumf %6, %7 : vector<8x32xf32>
    %9 = arith.truncf %8 : vector<8x32xf32> to vector<8x32xbf16>
    %c0_6 = arith.constant 0 : index
    %c0_7 = arith.constant 0 : index
    %10 = vector.load %arg3[%c0_6, %c0_7] : memref<32x32xbf16, #tpu.memory_space<vmem>>, vector<32x32xbf16>
    %cst_8 = arith.constant dense<0.000000e+00> : vector<8x32xf32>
    %11 = tpu.matmul %9, %10, %cst_8 {dimension_numbers = #tpu.dot_dimension_numbers<[1], [0], [0], [1], [0, 0, 1, 1], [], []>} : vector<8x32xbf16>, vector<32x32xbf16>, vector<8x32xf32> -> vector<8x32xf32>
    %c0_9 = arith.constant 0 : index
    %c0_10 = arith.constant 0 : index
    %12 = vector.load %arg4[%c0_9, %c0_10] : memref<1x32xf32, #tpu.memory_space<vmem>>, vector<1x32xf32>
    %13 = vector.broadcast %12 : vector<1x32xf32> to vector<8x32xf32>
    %14 = arith.addf %11, %13 : vector<8x32xf32>
    %cst_11 = arith.constant 0.000000e+00 : f32
    %15 = vector.broadcast %cst_11 : f32 to vector<8x32xf32>
    %16 = arith.maximumf %14, %15 : vector<8x32xf32>
    %17 = arith.truncf %16 : vector<8x32xf32> to vector<8x32xbf16>
    %c0_12 = arith.constant 0 : index
    %c0_13 = arith.constant 0 : index
    %18 = vector.load %arg5[%c0_12, %c0_13] : memref<32x128xbf16, #tpu.memory_space<vmem>>, vector<32x128xbf16>
    %cst_14 = arith.constant dense<0.000000e+00> : vector<8x128xf32>
    %19 = tpu.matmul %17, %18, %cst_14 {dimension_numbers = #tpu.dot_dimension_numbers<[1], [0], [0], [1], [0, 0, 1, 1], [], []>} : vector<8x32xbf16>, vector<32x128xbf16>, vector<8x128xf32> -> vector<8x128xf32>
    %c0_15 = arith.constant 0 : index
    %c0_16 = arith.constant 0 : index
    %20 = vector.load %arg6[%c0_15, %c0_16] : memref<1x128xf32, #tpu.memory_space<vmem>>, vector<1x128xf32>
    %21 = vector.broadcast %20 : vector<1x128xf32> to vector<8x128xf32>
    %22 = arith.addf %19, %21 : vector<8x128xf32>
    %c0_17 = arith.constant 0 : index
    %c0_18 = arith.constant 0 : index
    %23 = vector.load %arg7[%c0_17, %c0_18] : memref<8x128xf32, #tpu.memory_space<vmem>>, vector<8x128xf32>
    tpu.vector_store %arg7[%c0_17, %c0_18], %22 {strides = array<i32>} : memref<8x128xf32, #tpu.memory_space<vmem>>, vector<8x128xf32>,
    return
  }
}

</mosaic_0001>

<bundles_post_ra>
// kernel: p1_net_forward.1
= control target key start
LH: loop header
LB: loop body
LE: loop exit
PB: predicated region body
PF: predicated region fallthrough
CT: control target
= control target key end

     0   :  { %vm1118_vm0 = vmmov 0   ;;  %vm747_vm1 = vcmask 261120   ;;  %s1399_s1 = inlined_call_operand.vmem [shape: bf16[1024,32], index: 1, kind: input, shape index: {}]   ;;  %s1400_s0 = inlined_call_operand.vmem [shape: f32[8,1024], index: 0, kind: input, shape index: {}]   ;;  %s1401_s3 = inlined_call_operand.vmem [shape: bf16[32,32], index: 3, kind: input, shape index: {}]   ;;  %s1402_s5 = inlined_call_operand.vmem [shape: bf16[32,128], index: 5, kind: input, shape index: {}]   ;;  %s1403_s2 = inlined_call_operand.vmem [shape: f32[1,32], index: 2, kind: input, shape index: {}]   ;;  %s1404_s4 = inlined_call_operand.vmem [shape: f32[1,32], index: 4, kind: input, shape index: {}]   ;;  %s1405_s6 = inlined_call_operand.vmem [shape: f32[1,128], index: 6, kind: input, shape index: {}]   ;;  %s1406_s7 = inlined_call_operand.vmem [shape: f32[8,128], index: 7, kind: output, shape index: {}]  }
   0x1   :  { %v1049_v0 = vld [vmem:[%s1399_s1 + $0x78] sm:$0xff]   ;;  %v1053_v4 = vld [vmem:[%s1399_s1 + $0x70] sm:$0xff]   ;;  %v1057_v8 = vld [vmem:[%s1399_s1 + $0x68] sm:$0xff]  }
   0x2   :  { %v1050_v1 = vld [vmem:[%s1399_s1 + $0xf8] sm:$0xff]   ;;  %937 = vmatprep.subr.bf16.mxu0 %v1049_v0  ;;  %v1054_v5 = vld [vmem:[%s1399_s1 + $0xf0] sm:$0xff]   ;;  %v1058_v9 = vld [vmem:[%s1399_s1 + $0xe8] sm:$0xff]  }
   0x3   :  { %v1051_v2 = vld [vmem:[%s1399_s1 + $0x38] sm:$0xff]   ;;  %959 = vmatprep.subr.bf16.mxu1 %v1050_v1  ;;  %v1055_v6 = vld [vmem:[%s1399_s1 + $0x30] sm:$0xff]   ;;  %v1059_v10 = vld [vmem:[%s1399_s1 + $0x28] sm:$0xff]  }
   0x4   :  { %v1052_v3 = vld [vmem:[%s1399_s1 + $0xb8] sm:$0xff]   ;;  %938 = vmatpush3.bf16.msra.mxu0 %v1051_v2  ;;  %v1056_v7 = vld [vmem:[%s1399_s1 + $0xb0] sm:$0xff]   ;;  %v1060_v11 = vld [vmem:[%s1399_s1 + $0xa8] sm:$0xff]  }
   0x5   :  { %960 = vmatpush3.bf16.msra.mxu1 %v1052_v3  ;;  %939 = vmatprep.subr.bf16.mxu0 %v1053_v4  ;;  %v1061_v12 = vld [vmem:[%s1399_s1 + $0x60] sm:$0xff]   ;;  %v1065_v16 = vld [vmem:[%s1399_s1 + $0x58] sm:$0xff]   ;;  %v1069_v20 = vld [vmem:[%s1399_s1 + $0x50] sm:$0xff]  }
   0x6   :  { %961 = vmatprep.subr.bf16.mxu1 %v1054_v5  ;;  %v1062_v13 = vld [vmem:[%s1399_s1 + $0xe0] sm:$0xff]   ;;  %v1066_v17 = vld [vmem:[%s1399_s1 + $0xd8] sm:$0xff]   ;;  %v1070_v21 = vld [vmem:[%s1399_s1 + $0xd0] sm:$0xff]  }
   0x7   :  { %v1063_v14 = vld [vmem:[%s1399_s1 + $0x20] sm:$0xff]   ;;  %v1067_v18 = vld [vmem:[%s1399_s1 + $0x18] sm:$0xff]   ;;  %v1071_v22 = vld [vmem:[%s1399_s1 + $0x10] sm:$0xff]  }
   0x8   :  { %940 = vmatpush3.bf16.msra.mxu0 %v1055_v6  ;;  %v1064_v15 = vld [vmem:[%s1399_s1 + $0xa0] sm:$0xff]   ;;  %v1068_v19 = vld [vmem:[%s1399_s1 + $0x98] sm:$0xff]   ;;  %v1072_v23 = vld [vmem:[%s1399_s1 + $0x90] sm:$0xff]  }
   0x9   :  { %962 = vmatpush3.bf16.msra.mxu1 %v1056_v7  ;;  %941 = vmatprep.subr.bf16.mxu0 %v1057_v8  ;;  %v1073_v24 = vld [vmem:[%s1399_s1 + $0x48] sm:$0xff]   ;;  %v1077_v28 = vld [vmem:[%s1399_s1 + $0x40] sm:$0xff]   ;;  %v30_v33 = vld [vmem:[%s1400_s0 + $0x18] sm:$0xff] }
   0xa   :  { %963 = vmatprep.subr.bf16.mxu1 %v1058_v9  ;;  %v1074_v25 = vld [vmem:[%s1399_s1 + $0xc8] sm:$0xff]   ;;  %v1078_v29 = vld [vmem:[%s1399_s1 + $0xc0] sm:$0xff]   ;;  %v38_v36 = vpack.c.bf16 %v30_v33, %v30_v33  ;;  %v29_v38 = vld [vmem:[%s1400_s0 + $0x10] sm:$0xff] }
   0xb   :  { %v1075_v26 = vld [vmem:[%s1399_s1 + $0x8] sm:$0xff]   ;;  %v1079_v30 = vld [vmem:[%s1399_s1] sm:$0xff]   ;;  %v37_v39 = vpack.c.bf16 %v29_v38, %v29_v38  ;;  %v1081_v40 = vld [vmem:[%s1399_s1 + $0x178] sm:$0xff]  }
   0xc   :  { %942 = vmatpush3.bf16.msra.mxu0 %v1059_v10  ;;  %v1076_v27 = vld [vmem:[%s1399_s1 + $0x88] sm:$0xff]   ;;  %v1080_v31 = vld [vmem:[%s1399_s1 + $0x80] sm:$0xff]   ;;  %634 = vmatprep.mubr.bf16.mxu1 %v38_v36  ;;  %v1082_v41 = vld [vmem:[%s1399_s1 + $0x1f8] sm:$0xff]  }
   0xd   :  { %964 = vmatpush3.bf16.msra.mxu1 %v1060_v11  ;;  %943 = vmatprep.subr.bf16.mxu0 %v1061_v12  ;;  %v28_v32 = vld [vmem:[%s1400_s0 + $0x8] sm:$0xff]  ;;  %v27_v34 = vld [vmem:[%s1400_s0] sm:$0xff]  ;;  %v1083_v42 = vld [vmem:[%s1399_s1 + $0x138] sm:$0xff]  }
   0xe   :  { %965 = vmatprep.subr.bf16.mxu1 %v1062_v13  ;;  %v36_v35 = vpack.c.bf16 %v28_v32, %v28_v32  ;;  %v35_v37 = vpack.c.bf16 %v27_v34, %v27_v34  ;;  %v1084_v43 = vld [vmem:[%s1399_s1 + $0x1b8] sm:$0xff]   ;;  %v1085_v44 = vld [vmem:[%s1399_s1 + $0x170] sm:$0xff]   ;;  %v1089_v48 = vld [vmem:[%s1399_s1 + $0x168] sm:$0xff]  }
   0xf   :  { %v1086_v45 = vld [vmem:[%s1399_s1 + $0x1f0] sm:$0xff]   ;;  %v1090_v49 = vld [vmem:[%s1399_s1 + $0x1e8] sm:$0xff]   ;;  %v1093_v52 = vld [vmem:[%s1399_s1 + $0x160] sm:$0xff]  }
  0x10   :  { %944 = vmatpush3.bf16.msra.mxu0 %v1063_v14  ;;  %594 = vmatprep.mubr.bf16.mxu0 %v36_v35  ;;  %v1087_v46 = vld [vmem:[%s1399_s1 + $0x130] sm:$0xff]   ;;  %v1091_v50 = vld [vmem:[%s1399_s1 + $0x128] sm:$0xff]   ;;  %v1094_v53 = vld [vmem:[%s1399_s1 + $0x1e0] sm:$0xff]  }
  0x11   :  { %966 = vmatpush3.bf16.msra.mxu1 %v1064_v15  ;;  %945 = vmatprep.subr.bf16.mxu0 %v1065_v16  ;;  %v1088_v47 = vld [vmem:[%s1399_s1 + $0x1b0] sm:$0xff]   ;;  %v1092_v51 = vld [vmem:[%s1399_s1 + $0x1a8] sm:$0xff]   ;;  %v1095_v54 = vld [vmem:[%s1399_s1 + $0x120] sm:$0xff]  }
  0x12   :  { %967 = vmatprep.subr.bf16.mxu1 %v1066_v17  ;;  %v1096_v55 = vld [vmem:[%s1399_s1 + $0x1a0] sm:$0xff]   ;;  %v1097_v56 = vld [vmem:[%s1399_s1 + $0x158] sm:$0xff]   ;;  %v1101_v60 = vld [vmem:[%s1399_s1 + $0x150] sm:$0xff]   ;;  %v1117_v17 = vmov 0.0  }
  0x13   :  { %v1098_v57 = vld [vmem:[%s1399_s1 + $0x1d8] sm:$0xff]   ;;  %v1102_v61 = vld [vmem:[%s1399_s1 + $0x1d0] sm:$0xff]   ;;  %v1105_v0 = vld [vmem:[%s1399_s1 + $0x148] sm:$0xff]  }
  0x14   :  { %946 = vmatpush3.bf16.msra.mxu0 %v1067_v18  ;;  %v1099_v58 = vld [vmem:[%s1399_s1 + $0x118] sm:$0xff]   ;;  %v1103_v62 = vld [vmem:[%s1399_s1 + $0x110] sm:$0xff]   ;;  %v1106_v1 = vld [vmem:[%s1399_s1 + $0x1c8] sm:$0xff]  }
  0x15   :  { %968 = vmatpush3.bf16.msra.mxu1 %v1068_v19  ;;  %947 = vmatprep.subr.bf16.mxu0 %v1069_v20  ;;  %v1100_v59 = vld [vmem:[%s1399_s1 + $0x198] sm:$0xff]   ;;  %v1104_v63 = vld [vmem:[%s1399_s1 + $0x190] sm:$0xff]   ;;  %v1107_v2 = vld [vmem:[%s1399_s1 + $0x108] sm:$0xff]  }
  0x16   :  { %969 = vmatprep.subr.bf16.mxu1 %v1070_v21  ;;  %v1108_v3 = vld [vmem:[%s1399_s1 + $0x188] sm:$0xff]   ;;  %v1109_v4 = vld [vmem:[%s1399_s1 + $0x140] sm:$0xff]   ;;  %v34_v9 = vld [vmem:[%s1400_s0 + $0x38] sm:$0xff] }
  0x17   :  { %v1110_v5 = vld [vmem:[%s1399_s1 + $0x1c0] sm:$0xff]   ;;  %v32_v8 = vld [vmem:[%s1400_s0 + $0x28] sm:$0xff]  ;;  %v42_v11 = vpack.c.bf16 %v34_v9, %v34_v9  ;;  %v33_v13 = vld [vmem:[%s1400_s0 + $0x30] sm:$0xff] }
  0x18   :  { %948 = vmatpush3.bf16.msra.mxu0 %v1071_v22  ;;  %v1111_v6 = vld [vmem:[%s1399_s1 + $0x100] sm:$0xff]   ;;  %v40_v10 = vpack.c.bf16 %v32_v8, %v32_v8  ;;  %v41_v15 = vpack.c.bf16 %v33_v13, %v33_v13  ;;  %v1113_v16 = vld [vmem:[%s1401_s3 + $0x8] sm:$0xff]  }
  0x19   :  { %970 = vmatpush3.bf16.msra.mxu1 %v1072_v23  ;;  %949 = vmatprep.subr.bf16.mxu0 %v1073_v24  ;;  %v1112_v7 = vld [vmem:[%s1399_s1 + $0x180] sm:$0xff]   ;;  %v1115_v19 = vld [vmem:[%s1402_s5 + $0x8] sm:$0xff]  }
  0x1a   :  { %971 = vmatprep.subr.bf16.mxu1 %v1074_v25  ;;  %v31_v12 = vld [vmem:[%s1400_s0 + $0x20] sm:$0xff] }
  0x1b   :  { %v39_v14 = vpack.c.bf16 %v31_v12, %v31_v12  ;;  %v1114_v18 = vld [vmem:[%s1401_s3] sm:$0xff]  }
  0x1c   :  { %950 = vmatpush3.bf16.msra.mxu0 %v1075_v26 }
  0x1d   :  { %972 = vmatpush3.bf16.msra.mxu1 %v1076_v27  ;;  %951 = vmatprep.subr.bf16.mxu0 %v1077_v28 }
  0x1e   :  { %973 = vmatprep.subr.bf16.mxu1 %v1078_v29  ;;  %v864_v29 = vld [vmem:[%s1403_s2] ss:$0 sm:$0xff] }
  0x20   :  { %952 = vmatpush3.bf16.msra.mxu0 %v1079_v30 }
  0x21   :  { %974 = vmatpush3.bf16.msra.mxu1 %v1080_v31  ;;  %981 = vmatprep.subr.bf16.mxu0 %v1081_v40 }
  0x22   :  { %1003 = vmatprep.subr.bf16.mxu1 %v1082_v41 }
  0x23   :  { %595 = vmatmul.mubr.bf16.vlgmr.msra.gmra.mxu0 %v35_v37 }
  0x24   :  { %635 = vmatmul.mubr.bf16.vlgmr.msra.gmra.mxu1 %v37_v39  ;;  %982 = vmatpush3.bf16.msra.mxu0 %v1083_v42 }
  0x25   :  { %1004 = vmatpush3.bf16.msra.mxu1 %v1084_v43  ;;  %983 = vmatprep.subr.bf16.mxu0 %v1085_v44 }
  0x26   :  { %1005 = vmatprep.subr.bf16.mxu1 %v1086_v45  ;;  %674 = vmatprep.mubr.bf16.mxu0 %v40_v10 }
  0x27   :  { %714 = vmatprep.mubr.bf16.mxu1 %v42_v11 }
  0x28   :  { %984 = vmatpush3.bf16.msra.mxu0 %v1087_v46 }
  0x29   :  { %1006 = vmatpush3.bf16.msra.mxu1 %v1088_v47  ;;  %985 = vmatprep.subr.bf16.mxu0 %v1089_v48  ;;  %v1116_v47 = vld [vmem:[%s1402_s5] sm:$0xff]  }
  0x2a   :  { %1007 = vmatprep.subr.bf16.mxu1 %v1090_v49  ;;  %v929_v48 = vld [vmem:[%s1404_s4] ss:$0 sm:$0xff] }
  0x2c   :  { %986 = vmatpush3.bf16.msra.mxu0 %v1091_v50 }
  0x2d   :  { %1008 = vmatpush3.bf16.msra.mxu1 %v1092_v51  ;;  %987 = vmatprep.subr.bf16.mxu0 %v1093_v52 }
  0x2e   :  { %1009 = vmatprep.subr.bf16.mxu1 %v1094_v53 }
  0x30   :  { %988 = vmatpush3.bf16.msra.mxu0 %v1095_v54 }
  0x31   :  { %1010 = vmatpush3.bf16.msra.mxu1 %v1096_v55  ;;  %989 = vmatprep.subr.bf16.mxu0 %v1097_v56  ;;  %v933_v56 = vld [vmem:[%s1405_s6] ss:$0 sm:$0xff] }
  0x32   :  { %1011 = vmatprep.subr.bf16.mxu1 %v1098_v57 }
  0x34   :  { %990 = vmatpush3.bf16.msra.mxu0 %v1099_v58 }
  0x35   :  { %1012 = vmatpush3.bf16.msra.mxu1 %v1100_v59  ;;  %991 = vmatprep.subr.bf16.mxu0 %v1101_v60 }
  0x36   :  { %1013 = vmatprep.subr.bf16.mxu1 %v1102_v61 }
  0x38   :  { %992 = vmatpush3.bf16.msra.mxu0 %v1103_v62 }
  0x39   :  { %1014 = vmatpush3.bf16.msra.mxu1 %v1104_v63  ;;  %993 = vmatprep.subr.bf16.mxu0 %v1105_v0 }
  0x3a   :  { %1015 = vmatprep.subr.bf16.mxu1 %v1106_v1 }
  0x3c   :  { %994 = vmatpush3.bf16.msra.mxu0 %v1107_v2 }
  0x3d   :  { %1016 = vmatpush3.bf16.msra.mxu1 %v1108_v3  ;;  %995 = vmatprep.subr.bf16.mxu0 %v1109_v4 }
  0x3e   :  { %1017 = vmatprep.subr.bf16.mxu1 %v1110_v5 }
  0x40   :  { %996 = vmatpush3.bf16.msra.mxu0 %v1111_v6 }
  0x41   :  { %1018 = vmatpush3.bf16.msra.mxu1 %v1112_v7  ;;  %1031 = vmatprep.subr.bf16.mxu0 %v1117_v17 }
  0x42   :  { %1039 = vmatprep.subr.bf16.mxu1 %v1117_v17 }
  0x43   :  { %675 = vmatmul.mubr.bf16.vlgmr.msra.gmra.mxu0 %v39_v14 }
  0x44   :  { %715 = vmatmul.mubr.bf16.vlgmr.msra.gmra.mxu1 %v41_v15  ;;  %1032 = vmatpush3.bf16.msra.mxu0 %v1113_v16 }
  0x45   :  { %1033 = vmatprep.subr.bf16.mxu0 %v1117_v17  ;;  %1035 = vmatprep.mubr.msk.bf16.mxu0 %vm1118_vm0, %v1117_v17 }
  0x46   :  { %1043 = vmatprep.mubr.msk.bf16.mxu1 %vm1118_vm0, %v1117_v17  ;;  %1040 = vmatpush3.bf16.msra.mxu1 %v1115_v19 }
  0x47   :  { %1041 = vmatprep.subr.bf16.mxu1 %v1117_v17 }
  0x48   :  { %1034 = vmatpush3.bf16.msra.mxu0 %v1114_v18 }
  0x4a   :  { %1042 = vmatpush3.bf16.msra.mxu1 %v1116_v47 }
  0xe3   :  { %v953_v20 = vpop.f32.mrf.mxu0 }
  0xe4   :  { %v975_v21 = vpop.f32.mrf.mxu1 }
  0xe5   :  { %v954_v22 = vpop.f32.mrf.mxu0 }
  0xe6   :  { %v976_v23 = vpop.f32.mrf.mxu1  ;;  %v955_v28 = vadd.f32 %v954_v22, %v953_v20 }
  0xe7   :  { %v956_v24 = vpop.f32.mrf.mxu0  ;;  %v977_v31 = vadd.f32 %v976_v23, %v975_v21 }
  0xe8   :  { %v978_v25 = vpop.f32.mrf.mxu1  ;;  %v597_v30 = vadd.f32 %v955_v28, %v864_v29 }
  0xe9   :  { %v957_v26 = vpop.f32.mrf.mxu0 }
  0xea   :  { %v979_v27 = vpop.f32.mrf.mxu1  ;;  %v637_v35 = vadd.f32 %v977_v31, %v597_v30 }
 0x103   :  { %v997_v32 = vpop.f32.mrf.mxu0 }
 0x104   :  { %v1019_v33 = vpop.f32.mrf.mxu1 }
 0x105   :  { %v998_v34 = vpop.f32.mrf.mxu0 }
 0x106   :  { %v999_v36 = vadd.f32 %v998_v34, %v997_v32  ;;  %v1020_v37 = vpop.f32.mrf.mxu1 }
 0x107   :  { %v1000_v38 = vpop.f32.mrf.mxu0  ;;  %v1021_v40 = vadd.f32 %v1020_v37, %v1019_v33 }
 0x108   :  { %v677_v39 = vadd.f32 %v999_v36, %v637_v35  ;;  %v1022_v41 = vpop.f32.mrf.mxu1 }
 0x109   :  { %v1001_v42 = vpop.f32.mrf.mxu0 }
 0x10a   :  { %v717_v43 = vadd.f32 %v1021_v40, %v677_v39  ;;  %v1023_v44 = vpop.f32.mrf.mxu1 }
 0x10c   :  { %v722_v45 = vmax.f32 %v717_v43, 0.0 }
 0x10e   :  { %v723_v46 = vpack.c.bf16 %v722_v45, %v722_v45 }
 0x110   :  { %1036 = vmatmul.mubr.msk.bf16.vlgmr.msra.gmra.mxu0 %vm747_vm1, %v723_v46 }
 0x1d0   :  { %v785_v49 = vpop.f32.mrf.mxu0 }
 0x1d1   :  { %v786_v50 = vadd.f32 %v929_v48, %v785_v49 }
 0x1d2   :  { %v1037_v51 = vpop.f32.mrf.mxu0 }
 0x1d3   :  { %v791_v52 = vmax.f32 %v786_v50, 0.0 }
 0x1d4   :  { %v788_v53 = vpop.f32.mrf.mxu0 }
 0x1d5   :  { %v792_v54 = vpack.c.bf16 %v791_v52, %v791_v52 }
 0x1d6   :  { %v1038_v55 = vpop.f32.mrf.mxu0 }
 0x1d7   :  { %1044 = vmatmul.mubr.msk.bf16.vlgmr.msra.gmra.mxu1 %vm747_vm1, %v792_v54 }
 0x297   :  { %v853_v57 = vpop.f32.mrf.mxu1 }
 0x298   :  { %v854_v58 = vadd.f32 %v933_v56, %v853_v57 }
 0x299   :  { %v1045_v59 = vpop.f32.mrf.mxu1 }
 0x29a   :  { %859 = vst [vmem:[%s1406_s7] sm:$0xff] %v854_v58 }
 0x29b   :  { %v856_v60 = vpop.f32.mrf.mxu1 }
 0x29d   :  { %v1046_v61 = vpop.f32.mrf.mxu1 }

</bundles_post_ra>
